<compile_context>
chip_gen: v5e
topology: v5e:2x2
jax: 0.10.0
libtpu: 0.0.40
codegen_flags: <defaults>
</compile_context>

<pallas_src>
import jax
import jax.numpy as jnp
from jax.experimental import pallas as pl
from jax.experimental.pallas import tpu as pltpu


def _style_loss_kernel(scale_ref, feat_ref, tgt_ref, loss_ref, acc_ref):
    """One K-chunk of the Gram reduction.

    scale_ref: (1,)   f32 SMEM  -- weight / (N*C*H*W)
    feat_ref:  (M,tk) VMEM      -- current chunk of the flattened feature map
    tgt_ref:   (M,M)  VMEM      -- target gram * weight (resident across the grid)
    loss_ref:  (1,1)  f32 SMEM  -- output scalar MSE loss
    acc_ref:   (M,M)  f32 VMEM scratch -- running (unnormalized) gram accumulator
    """
    k = pl.program_id(0)

    @pl.when(k == 0)
    def _init():
        acc_ref[...] = jnp.zeros_like(acc_ref)

    feat = feat_ref[...]  # feed native dtype straight to the MXU
    acc_ref[...] += jax.lax.dot_general(
        feat, feat,
        dimension_numbers=(((1,), (1,)), ((), ())),  # contract K of both operands
        preferred_element_type=jnp.float32,
    )

    @pl.when(k == pl.num_programs(0) - 1)
    def _finalize():
        m = tgt_ref.shape[0]
        g = acc_ref[...] * scale_ref[0]              # gram/(N*C*H*W) * weight, fused
        diff = g - tgt_ref[...].astype(jnp.float32)
        loss_ref[0, 0] = jnp.sum(diff * diff) * (1.0 / float(m * m))


def _round_up(x, m):
    return ((x + m - 1) // m) * m


def _gram_ref(x):
    """Pure-JAX reference Gram (target construction & correctness check only)."""
    n, c, h, w = x.shape
    feat = x.reshape(n * c, h * w).astype(jnp.float32)
    return (feat @ feat.T) / (n * c * h * w)


class StyleLossPallas:
    """Mirror of the PyTorch Style_Loss module.

    __init__(target_gram, weight): stores target_gram * weight (target.detach() * weight).
    __call__(x):                   returns (out, loss); out is x (clone is a no-op) and
                                   loss == MSE(gram(x) * weight, target).
    """

    def __init__(self, target_gram, weight):
        self.weight = float(weight)
        self.target = (jnp.asarray(target_gram) * self.weight).astype(jnp.float32)

    def __call__(self, x):
        n, c, h, w = x.shape
        m, k = n * c, h * w
        feature = x.reshape(m, k)

        # Lane-aligned K tile; zero-pad K (gram-preserving) so tk | k_pad.
        tk = min(512, _round_up(k, 128))
        k_pad = _round_up(k, tk)
        if k_pad != k:
            feature = jnp.pad(feature, ((0, 0), (0, k_pad - k)))
        grid_k = k_pad // tk

        # weight / (N*C*H*W) as an SMEM scalar (kernel reusable across weights).
        scale = jnp.full((1,), self.weight / float(n * c * h * w), dtype=jnp.float32)

        loss2d = pl.pallas_call(
            _style_loss_kernel,
            out_shape=jax.ShapeDtypeStruct((1, 1), jnp.float32),
            grid=(grid_k,),
            in_specs=[
                pl.BlockSpec(memory_space=pltpu.MemorySpace.SMEM),      # scale
                pl.BlockSpec((m, tk), lambda kk: (0, kk)),              # feat K-chunk
                pl.BlockSpec((m, m), lambda kk: (0, 0)),                # target (resident)
            ],
            out_specs=pl.BlockSpec(memory_space=pltpu.MemorySpace.SMEM),
            scratch_shapes=[pltpu.VMEM((m, m), jnp.float32)],
            compiler_params=pltpu.CompilerParams(
                dimension_semantics=("arbitrary",),
            ),
        )(scale, feature, self.target)

        self.loss = loss2d[0, 0]
        # forward() returns input.clone(); JAX arrays are immutable, so x itself is the clone.
        return x, self.loss


if __name__ == "__main__":
    key = jax.random.PRNGKey(0)
    k_style, k_input, k_style2, k_input2 = jax.random.split(key, 4)

    # ---- Primary case: N=2, C=4, H=W=16 (M=8, K=256) -----------------------
    N, C, H, W = 2, 4, 16, 16
    weight = 1000.0

    style_feat = jax.random.normal(k_style, (N, C, H, W), dtype=jnp.float32)
    target_gram = _gram_ref(style_feat)
    x = jax.random.normal(k_input, (N, C, H, W), dtype=jnp.float32)

    style_loss = StyleLossPallas(target_gram, weight)
    out, loss = style_loss(x)
    jax.block_until_ready((out, loss))

    G_ref = _gram_ref(x) * weight
    loss_ref = jnp.mean((G_ref - target_gram * weight) ** 2)

    assert out.shape == x.shape
    assert jnp.allclose(out, x)                                 # pass-through
    assert jnp.allclose(loss, loss_ref, rtol=1e-5, atol=1e-5)

    # ---- Secondary case: K not a multiple of 128 (exercises zero-padding) ---
    N2, C2, H2, W2 = 1, 4, 12, 12
    style_feat2 = jax.random.normal(k_style2, (N2, C2, H2, W2), dtype=jnp.float32)
    x2 = jax.random.normal(k_input2, (N2, C2, H2, W2), dtype=jnp.float32)
    sl2 = StyleLossPallas(_gram_ref(style_feat2), 10.0)
    out2, loss2 = sl2(x2)
    jax.block_until_ready((out2, loss2))
    loss2_ref = jnp.mean((_gram_ref(x2) * 10.0 - _gram_ref(style_feat2) * 10.0) ** 2)
    assert jnp.allclose(out2, x2)
    assert jnp.allclose(loss2, loss2_ref, rtol=1e-5, atol=1e-5)

    print("KERNEL_OK")
</pallas_src>

<mosaic_0001>
module attributes {stable_mosaic.version = 11 : i64} {
  func.func @_style_loss_kernel(%arg0: i32, %arg1: memref<1xf32, #tpu.memory_space<smem>>, %arg2: memref<8x256xf32, #tpu.memory_space<vmem>>, %arg3: memref<8x8xf32, #tpu.memory_space<vmem>>, %arg4: memref<1x1xf32, #tpu.memory_space<smem>>, %arg5: memref<8x8xf32, #tpu.memory_space<vmem>>) attributes {dimension_semantics = [#tpu.dimension_semantics<arbitrary>], iteration_bounds = array<i64: 1>, scalar_prefetch = 0 : i64, scratch_operands = 1 : i64, tpu.core_type = #tpu.core_type<tc>, window_params = [{transform_indices = @transform_0, window_bounds = array<i64: 1>}, {transform_indices = @transform_1, window_bounds = array<i64: 8, 256>}, {pipeline_mode = #tpu.pipeline_mode<synchronous>, transform_indices = @transform_2, window_bounds = array<i64: 8, 8>}, {transform_indices = @transform_3, window_bounds = array<i64: 1, 1>}]} {
    %c0_i32 = arith.constant 0 : i32
    %0 = arith.cmpi eq, %arg0, %c0_i32 : i32
    %1 = arith.extui %0 : i1 to i32
    %c0_i32_0 = arith.constant 0 : i32
    %2 = arith.cmpi ne, %1, %c0_i32_0 : i32
    scf.if %2 {
      %cst_8 = arith.constant 0.000000e+00 : f32
      %11 = vector.broadcast %cst_8 : f32 to vector<8x8xf32>
      %c0_9 = arith.constant 0 : index
      %c0_10 = arith.constant 0 : index
      %12 = vector.load %arg5[%c0_9, %c0_10] : memref<8x8xf32, #tpu.memory_space<vmem>>, vector<8x8xf32>
      tpu.vector_store %arg5[%c0_9, %c0_10], %11 {strides = array<i32>} : memref<8x8xf32, #tpu.memory_space<vmem>>, vector<8x8xf32>,
    } else {
    }
    %c0 = arith.constant 0 : index
    %c0_1 = arith.constant 0 : index
    %3 = vector.load %arg2[%c0, %c0_1] : memref<8x256xf32, #tpu.memory_space<vmem>>, vector<8x256xf32>
    %c0_2 = arith.constant 0 : index
    %c0_3 = arith.constant 0 : index
    %4 = vector.load %arg5[%c0_2, %c0_3] : memref<8x8xf32, #tpu.memory_space<vmem>>, vector<8x8xf32>
    %cst = arith.constant dense<0.000000e+00> : vector<8x8xf32>
    %5 = tpu.matmul %3, %3, %cst {dimension_numbers = #tpu.dot_dimension_numbers<[1], [1], [0], [0], [0, 0, 1, 0], [], []>} : vector<8x256xf32>, vector<8x256xf32>, vector<8x8xf32> -> vector<8x8xf32>
    %6 = arith.addf %4, %5 : vector<8x8xf32>
    %c0_4 = arith.constant 0 : index
    %c0_5 = arith.constant 0 : index
    %7 = vector.load %arg5[%c0_4, %c0_5] : memref<8x8xf32, #tpu.memory_space<vmem>>, vector<8x8xf32>
    tpu.vector_store %arg5[%c0_4, %c0_5], %6 {strides = array<i32>} : memref<8x8xf32, #tpu.memory_space<vmem>>, vector<8x8xf32>,
    %c0_i32_6 = arith.constant 0 : i32
    %8 = arith.cmpi eq, %arg0, %c0_i32_6 : i32
    %9 = arith.extui %8 : i1 to i32
    %c0_i32_7 = arith.constant 0 : i32
    %10 = arith.cmpi ne, %9, %c0_i32_7 : i32
    scf.if %10 {
      %c0_8 = arith.constant 0 : index
      %c0_9 = arith.constant 0 : index
      %11 = vector.load %arg5[%c0_8, %c0_9] : memref<8x8xf32, #tpu.memory_space<vmem>>, vector<8x8xf32>
      %c0_10 = arith.constant 0 : index
      %12 = memref.load %arg1[%c0_10] : memref<1xf32, #tpu.memory_space<smem>>
      %13 = vector.broadcast %12 : f32 to vector<8x8xf32>
      %14 = arith.mulf %11, %13 : vector<8x8xf32>
      %c0_11 = arith.constant 0 : index
      %c0_12 = arith.constant 0 : index
      %15 = vector.load %arg3[%c0_11, %c0_12] : memref<8x8xf32, #tpu.memory_space<vmem>>, vector<8x8xf32>
      %16 = arith.subf %14, %15 : vector<8x8xf32>
      %17 = arith.mulf %16, %16 : vector<8x8xf32>
      %18 = vector.shape_cast %17 : vector<8x8xf32> to vector<1x8x8xf32>
      %cst_13 = arith.constant dense<0.000000e+00> : vector<1xf32>
      %19 = vector.multi_reduction <add>, %18, %cst_13 [1, 2] : vector<1x8x8xf32> to vector<1xf32>
      %20 = vector.shape_cast %19 : vector<1xf32> to vector<1x1x1xf32>
      %21 = vector.extract %20[0, 0, 0] : f32 from vector<1x1x1xf32>
      %cst_14 = arith.constant 1.562500e-02 : f32
      %22 = arith.mulf %21, %cst_14 : f32
      %c0_15 = arith.constant 0 : index
      %c0_16 = arith.constant 0 : index
      %23 = memref.load %arg4[%c0_15, %c0_16] : memref<1x1xf32, #tpu.memory_space<smem>>
      memref.store %22, %arg4[%c0_15, %c0_16] : memref<1x1xf32, #tpu.memory_space<smem>>
    } else {
    }
    return
  }
  func.func @transform_0(%arg0: i32) -> i32 {
    %c0_i32 = arith.constant 0 : i32
    %c0_i32_0 = arith.constant 0 : i32
    return %c0_i32 : i32
  }
  func.func @transform_1(%arg0: i32) -> (i32, i32) {
    %c0_i32 = arith.constant 0 : i32
    %c0_i32_0 = arith.constant 0 : i32
    return %c0_i32, %arg0 : i32, i32
  }
  func.func @transform_2(%arg0: i32) -> (i32, i32) {
    %c0_i32 = arith.constant 0 : i32
    %c0_i32_0 = arith.constant 0 : i32
    %c0_i32_1 = arith.constant 0 : i32
    return %c0_i32, %c0_i32_0 : i32, i32
  }
  func.func @transform_3(%arg0: i32) -> (i32, i32) {
    %c0_i32 = arith.constant 0 : i32
    %c0_i32_0 = arith.constant 0 : i32
    %c0_i32_1 = arith.constant 0 : i32
    return %c0_i32, %c0_i32_0 : i32, i32
  }
}

</mosaic_0001>

<bundles_post_ra>
// kernel: tpu_custom_call.1
= control target key start
LH: loop header
LB: loop body
LE: loop exit
PB: predicated region body
PF: predicated region fallthrough
CT: control target
= control target key end

     0   :  { %9 = vsyncpa [#allocation5], 0  ;;  %s244_s0 = inlined_call_operand.<no memory space> [shape: f32[1], index: 0, kind: input, shape index: {}]   ;;  %s245_s1 = inlined_call_operand.hbm [shape: f32[8,256], index: 1, kind: input, shape index: {}]   ;;  %s246_s2 = inlined_call_operand.hbm [shape: f32[8,8], index: 2, kind: input, shape index: {}]   ;;  %s247_s3 = inlined_call_operand.hbm [shape: f32[1,1], index: 3, kind: output, shape index: {}]  }
   0x1   :  { %10 = vsyncpa [#allocation8], 0 }
   0x2   :  { %11 = vsyncpa [#allocation6], 0  ;;  %s19_s14 = sshll.u32 %s245_s1, 4  ;;  %s208_s15 = smov [#allocation4]   ;;  %s20_s14 = int_to_ptr.hbm [resolvable:$true] %s19_s14 }
   0x3   :  { %s21_s16 = sshll.u32 %s208_s15, 4  ;;  %s30_s19 = sshll.u32 %s246_s2, 4  ;;  %s22_s16 = int_to_ptr.vmem [resolvable:$true] %s21_s16  ;;  %s31_s19 = int_to_ptr.hbm [resolvable:$true] %s30_s19 }
   0x4   :  { %24 = dma.hbm_to_vmem [thread:$0]  %s20_s14, 256, %s22_s16, [#allocation5]  }
   0x5   :  { %s209_s20 = smov [#allocation7]  }
   0x6   :  { %s32_s21 = sshll.u32 %s209_s20, 4  ;;  %s33_s21 = int_to_ptr.vmem [resolvable:$true] %s32_s21 }
   0x7   :  { %35 = dma.hbm_to_vmem [thread:$0]  %s31_s19, 128, %s33_s21, [#allocation8]  }
   0x8   :  { %202 = dma.done.wait [#allocation5], 256  }
   0x9   :  { %203 = vsyncadd [#allocation5], 4294967040 }
   0xa   :  { %204 = dma.done.wait [#allocation8], 128  }
   0xb   :  { %205 = vsyncadd [#allocation8], 4294967168  ;;  %v50_v0 = vld [vmem:[#allocation4] sm:$0xff]  ;;  %v51_v1 = vld [vmem:[#allocation4 + $0x8] sm:$0xff]  ;;  %vm48_vm0 = vcmask 64512   ;;  %v210_v2 = vmov 0.0   ;;  %v101_v8 = vstv %s244_s0 }
   0xc   :  { %68 = vmatpush.xpose.msra.mxu0 %v50_v0  ;;  %88 = vmatpush.xpose.msra.mxu1 %v51_v1  ;;  %49 = vst.msk [vmem:[#allocation2] sm:$0xff] %vm48_vm0, %v210_v2  ;;  %v103_v10 = vld [vmem:[#allocation7] sm:$0xff]  ;;  %s124_s24 = sshll.u32 %s247_s3, 4  ;;  %s211_s26 = smov [#allocation9]   ;;  %s125_s24 = int_to_ptr.hbm [resolvable:$true] %s124_s24 }
   0xf   :  { %69 = vmatmul.f32.vlgmr.msra.gmra.mxu0 %v50_v0  ;;  %89 = vmatmul.f32.vlgmr.msra.gmra.mxu1 %v51_v1 }
  0x13   :  { %v52_v5 = vld [vmem:[#allocation2] sm:$0xff] }
  0x8c   :  { %v70_v3 = vpop.f32.mrf.mxu0  ;;  %v90_v4 = vpop.f32.mrf.mxu1 }
  0x8d   :  { %v91_v6 = vadd.f32 %v90_v4, %v70_v3 }
  0x8f   :  { %v93_v7 = vadd.f32 %v91_v6, %v52_v5 }
  0x91   :  { %95 = vst.msk [vmem:[#allocation2] sm:$0xff] %vm48_vm0, %v93_v7 }
  0x98   :  { %v99_v9 = vld [vmem:[#allocation2] sm:$0xff] }
  0x99   :  { %v102_v11 = vmul.f32 %v101_v8, %v99_v9 }
  0x9b   :  { %v104_v12 = vsub.f32 %v102_v11, %v103_v10 }
  0x9d   :  { %v105_v13 = vmul.f32 %v104_v12, %v104_v12 }
  0x9f   :  { %v106_v14 = vsel %vm48_vm0, %v105_v13, 0.0 }
  0xa0   :  { %107 = vadd.xlane.f32.xlu0 %v106_v14 }
 0x113   :  { %v108_v15 = vpop.xlane.xlu0 %107 }
 0x114   :  { %v109_v16 = vrot.slane %v108_v15, 4 }
 0x116   :  { %v110_v17 = vadd.f32 %v109_v16, %v108_v15 }
 0x118   :  { %v111_v18 = vrot.slane %v110_v17, 2 }
 0x11a   :  { %v112_v19 = vadd.f32 %v111_v18, %v110_v17 }
 0x11c   :  { %v113_v20 = vrot.slane %v112_v19, 1 }
 0x11e   :  { %v114_v21 = vadd.f32 %v113_v20, %v112_v19 }
 0x120   :  { %136 = vpush %v114_v21 }
 0x151   :  { %s137_s0 = spop %136 }
 0x152   :  { %s116_s25 = smul.f32 0.015625, %s137_s0 }
 0x154   :  { %118 = sst [smem:[#allocation9]] %s116_s25 }
 0x155   :  { %127 = dma.smem_to_hbm %s211_s26, 16, %s125_s24, [#allocation6]  }
 0x156   :  { %206 = dma.done.wait [#allocation6], 16  }
 0x157   :  { %207 = vsyncadd [#allocation6], 4294967280 }
 0x158   :  { %132 = sfence }
 0x159   :  { %133 = vsyncpa [#allocation5], 1 }
 0x15a   :  { %134 = vsyncpa [#allocation8], 1 }
 0x15b   :  { %135 = vsyncpa [#allocation6], 1 }

</bundles_post_ra>
